<compile_context>
chip_gen: v7x
topology: tpu7x:2x2x1
jax: 0.10.0
libtpu: 0.0.40
codegen_flags: <defaults>
</compile_context>

<pallas_src>
import math

import jax
import jax.numpy as jnp
from jax.experimental import pallas as pl
from jax.experimental.pallas import tpu as pltpu


def _pos_encoding_kernel(x_ref, pe_ref, o_ref):
    # x_ref: (TB, LT)   pe_ref: (1, LT)  -> broadcast-add over rows (batch).
    o_ref[...] = x_ref[...] + pe_ref[...]


def make_positional_encoding(d_model, max_seq_length, dtype=jnp.float32):
    """Same buffer as the PyTorch module's __init__ (built once, like
    register_buffer). Built in fp32, stored in the runtime dtype so forward()
    never re-converts the table per call."""
    position = jnp.arange(max_seq_length, dtype=jnp.float32)[:, None]        # (L, 1)
    div_term = jnp.exp(
        jnp.arange(0, d_model, 2, dtype=jnp.float32)
        * (-(math.log(10000.0) / d_model))
    )                                                                         # (ceil(D/2),)
    angles = position * div_term                                              # (L, ceil(D/2))
    pe = jnp.zeros((max_seq_length, d_model), dtype=jnp.float32)
    pe = pe.at[:, 0::2].set(jnp.sin(angles))
    # Truncate the cos column for odd d_model (PyTorch reference errors there).
    pe = pe.at[:, 1::2].set(jnp.cos(angles)[:, : d_model // 2])
    return pe.astype(dtype)


def _pick_tiles(B, SD, dtype_bytes, target_block_bytes=4 << 20):
    """Byte-budgeted (row, lane) tile so one block is ~target_block_bytes.

    Rules respected:
      * last-two block dims must be multiples of (8, 128) OR the full extent,
      * 2 (in) + 2 (out) double-buffered blocks + pe must fit scoped VMEM on
        every generation (v7x has only 64 MiB per TC).
    """
    elems_budget = max(128, target_block_bytes // dtype_bytes)

    # Row (batch) tile: full batch, or a multiple of 8.
    if B <= 8:
        tb = B
    else:
        rows = min(B, max(1, elems_budget // max(SD, 1)))
        if rows >= B:
            tb = B
        elif rows >= 8:
            tb = (rows // 8) * 8
        else:
            tb = 8

    # Lane tile: multiple of 128 under the byte budget, or the full extent
    # (a full-extent block dim is exempt from the (8,128) divisibility rule).
    if SD % 128 != 0:
        lt = SD
    else:
        per_row = max(128, ((elems_budget // tb) // 128) * 128)
        lt = min(SD, per_row)
    return tb, lt


def positional_encoding_forward(x, pe, *, donate_x=False):
    """x: (B, S, D); pe: (max_seq_length, D) precomputed buffer. Returns x + pe[:S].

    Set donate_x=True (under jit with a donated x) to let the output alias the
    input buffer; left off by default so eager callers keep value semantics.
    """
    B, S, D = x.shape
    pe_slice = pe[:S, :]                      # matches self.pe[:, :x.size(1)]
    if pe_slice.dtype != x.dtype:
        # NOTE: casting the fp32 table down (e.g. to bf16) before the add is a
        # tiny deviation from PyTorch's fp32-buffer promotion; negligible.
        pe_slice = pe_slice.astype(x.dtype)

    SD = S * D
    x2d = x.reshape(B, SD)                    # lane-dense: wide last dim
    pe2d = pe_slice.reshape(1, SD)

    dtype_bytes = jnp.dtype(x.dtype).itemsize
    TB, LT = _pick_tiles(B, SD, dtype_bytes)
    grid = (pl.cdiv(B, TB), pl.cdiv(SD, LT))

    cost = pl.CostEstimate(
        flops=B * SD,
        transcendentals=0,
        bytes_accessed=(2 * B * SD + SD) * dtype_bytes,   # read x + pe, write out
    )

    out = pl.pallas_call(
        _pos_encoding_kernel,
        out_shape=jax.ShapeDtypeStruct((B, SD), x.dtype),
        grid=grid,
        in_specs=[
            pl.BlockSpec((TB, LT), lambda i, j: (i, j)),   # x rows x lane chunks
            pl.BlockSpec((1, LT), lambda i, j: (0, j)),    # pe, shared across batch
        ],
        out_specs=pl.BlockSpec((TB, LT), lambda i, j: (i, j)),
        compiler_params=pltpu.CompilerParams(
            dimension_semantics=("parallel", "parallel"),  # both TCs on v7x
            vmem_limit_bytes=48 * 1024 * 1024,             # > v5e's 16 MiB default,
                                                           # < v7x's 64 MiB physical
        ),
        cost_estimate=cost,
        input_output_aliases=({0: 0} if donate_x else {}),
    )(x2d, pe2d)

    return out.reshape(B, S, D)


if __name__ == "__main__":
    # Module config: PositionalEncoding(d_model=32, max_seq_length=16)
    d_model = 32
    max_seq_length = 16
    batch, seq = 2, 8

    key = jax.random.PRNGKey(0)
    x = jax.random.normal(key, (batch, seq, d_model), dtype=jnp.float32)

    # Buffer precomputed once (equivalent of register_buffer in __init__).
    pe = make_positional_encoding(d_model, max_seq_length, dtype=x.dtype)

    out = positional_encoding_forward(x, pe)
    out = jax.block_until_ready(out)

    # Reference check in plain JAX
    ref = x + pe[None, :seq, :]
    assert out.shape == x.shape
    assert jnp.allclose(out, ref, atol=1e-6, rtol=1e-6), "mismatch vs reference"

    print("KERNEL_OK")
</pallas_src>

<mosaic_0001>
module attributes {stable_mosaic.version = 11 : i64} {
  func.func @_pos_encoding_kernel(%arg0: i32, %arg1: i32, %arg2: memref<2x256xf32, #tpu.memory_space<vmem>>, %arg3: memref<1x256xf32, #tpu.memory_space<vmem>>, %arg4: memref<2x256xf32, #tpu.memory_space<vmem>>) attributes {dimension_semantics = [#tpu.dimension_semantics<parallel>, #tpu.dimension_semantics<parallel>], iteration_bounds = array<i64: 1, 1>, scalar_prefetch = 0 : i64, scratch_operands = 0 : i64, tpu.core_type = #tpu.core_type<tc>, window_params = [{transform_indices = @transform_0, window_bounds = array<i64: 2, 256>}, {transform_indices = @transform_1, window_bounds = array<i64: 1, 256>}, {transform_indices = @transform_2, window_bounds = array<i64: 2, 256>}]} {
    %c0 = arith.constant 0 : index
    %c0_0 = arith.constant 0 : index
    %0 = vector.load %arg2[%c0, %c0_0] : memref<2x256xf32, #tpu.memory_space<vmem>>, vector<2x256xf32>
    %c0_1 = arith.constant 0 : index
    %c0_2 = arith.constant 0 : index
    %1 = vector.load %arg3[%c0_1, %c0_2] : memref<1x256xf32, #tpu.memory_space<vmem>>, vector<1x256xf32>
    %2 = vector.broadcast %1 : vector<1x256xf32> to vector<2x256xf32>
    %3 = arith.addf %0, %2 : vector<2x256xf32>
    %c0_3 = arith.constant 0 : index
    %c0_4 = arith.constant 0 : index
    %4 = vector.load %arg4[%c0_3, %c0_4] : memref<2x256xf32, #tpu.memory_space<vmem>>, vector<2x256xf32>
    tpu.vector_store %arg4[%c0_3, %c0_4], %3 {strides = array<i32>} : memref<2x256xf32, #tpu.memory_space<vmem>>, vector<2x256xf32>,
    return
  }
  func.func @transform_0(%arg0: i32, %arg1: i32) -> (i32, i32) {
    %c0_i32 = arith.constant 0 : i32
    return %arg0, %arg1 : i32, i32
  }
  func.func @transform_1(%arg0: i32, %arg1: i32) -> (i32, i32) {
    %c0_i32 = arith.constant 0 : i32
    %c0_i32_0 = arith.constant 0 : i32
    return %c0_i32, %arg1 : i32, i32
  }
  func.func @transform_2(%arg0: i32, %arg1: i32) -> (i32, i32) {
    %c0_i32 = arith.constant 0 : i32
    return %arg0, %arg1 : i32, i32
  }
}

</mosaic_0001>

<bundles_post_ra>
// kernel: tpu_custom_call.1
= control target key start
LH: loop header
LB: loop body
LE: loop exit
PB: predicated region body
PF: predicated region fallthrough
CT: control target
= control target key end

     0   :  { %7 = vsyncpa [#allocation3], 0  ;;  %s157_s0 = inlined_call_operand.hbm [shape: f32[2,256], index: 0, kind: input, shape index: {}]   ;;  %s158_s1 = inlined_call_operand.vmem [shape: f32[1,256], index: 1, kind: input, shape index: {}]   ;;  %s159_s2 = inlined_call_operand.hbm [shape: f32[2,256], index: 2, kind: output, shape index: {}]  }
   0x1   :  { %8 = vsyncpa [#allocation4], 0  ;;  %s112_s9 = smov [#allocation2]   ;;  %s64_s13 = scalar_lea.hbm %s157_s0, 64 }
   0x2   :  { %s15_s10 = sshll.u32 %s112_s9, 4  ;;  %p65_p0 = scmp.ne.s32.totalorder %s157_s0, %s64_s13  ;;  %s16_s10 = int_to_ptr.vmem [resolvable:$true] %s15_s10 }
   0x3   :  { %p68_p1 = scmp.lt.u32.totalorder %s64_s13, %s157_s0 }
   0x5   :  { %p70_p2 = pnand %p68_p1, %p65_p0 }
   0x7   :  { %73 = shalt.err (!%p70_p2)
}
   0x8   :  { %s74_s18 = scalar_lea.vmem %s16_s10, 64  ;;  %p79_p4 = scmp.lt.s32.totalorder %s16_s10, %s16_s10 }
   0x9   :  { %p75_p3 = scmp.ne.s32.totalorder %s16_s10, %s74_s18  ;;  %p80_p5 = scmp.lt.s32.totalorder %s74_s18, %s74_s18 }
   0xb   :  { %p81_p6 = por %p80_p5, %p79_p4 }
   0xd   :  { %p82_p7 = pnand %p81_p6, %p75_p3 }
   0xf   :  { %85 = shalt.err (!%p82_p7)
}
  0x10   :  { %18 = dma.hbm_to_vmem [thread:$0]  %s157_s0, 64, %s16_s10, [#allocation3]  }
  0x11   :  { %108 = dma.done.wait [#allocation3], 64  }
  0x12   :  { %109 = vsyncadd [#allocation3], 4294967232  ;;  %v27_v0 = vlaneseq  ;;  %v113_v1 = vmov 1983009808   ;;  %v25_v7 = vld [vmem:[%s158_s1] sm:$0x3] }
  0x13   :  { %v37_v2 = vunpack.c.l.s4 %v113_v1  ;;  %v24_v12 = vld [vmem:[#allocation2] sm:$0xf]  ;;  %s114_s23 = smov [#allocation5]  }
  0x14   :  { %v28_v3 = vshrl.u32 %v27_v0, 7  ;;  %s52_s0 = sshll.u32 %s114_s23, 4  ;;  %s53_s0 = int_to_ptr.vmem [resolvable:$true] %s52_s0 }
  0x15   :  { %v38_v6 = vunpack.c.0.s8 %v37_v2  ;;  %s86_s24 = scalar_lea.vmem %s53_s0, 64  ;;  %p91_p9 = scmp.lt.s32.totalorder %s53_s0, %s53_s0 }
  0x16   :  { %v29_v4 = vsub.s32 0, %v28_v3  ;;  %v33_v5 = vsub.s32 1, %v28_v3  ;;  %p87_p8 = scmp.ne.s32.totalorder %s53_s0, %s86_s24  ;;  %p92_p10 = scmp.lt.s32.totalorder %s86_s24, %s86_s24 }
  0x17   :  { %v41_v10 = vsub.s32 %v38_v6, %v28_v3 }
  0x18   :  { %v30_v8 = vrot.slane %v25_v7, %v29_v4  ;;  %v34_v9 = vrot.slane %v25_v7, %v33_v5  ;;  %p93_p11 = por %p92_p10, %p91_p9 }
  0x1a   :  { %v35_v11 = vcombine.low %v30_v8, %v34_v9  ;;  %p94_p12 = pnand %p93_p11, %p87_p8 }
  0x1c   :  { %v42_v13 = vrot.slane %v35_v11, %v41_v10 }
  0x1e   :  { %v44_v14 = vadd.f32 %v42_v13, %v24_v12 }
  0x20   :  { %45 = vst [vmem:[#allocation5] sm:$0xf] %v44_v14 }
  0x21   :  { %97 = shalt.err (!%p94_p12)
}
  0x22   :  { %s98_s26 = scalar_lea.hbm %s159_s2, 64 }
  0x23   :  { %p99_p13 = scmp.ne.s32.totalorder %s159_s2, %s98_s26  ;;  %p102_p0 = scmp.lt.u32.totalorder %s98_s26, %s159_s2 }
  0x25   :  { %p104_p1 = pnand %p102_p0, %p99_p13 }
  0x27   :  { %107 = shalt.err (!%p104_p1)
}
  0x28   :  { %55 = dma.vmem_to_hbm [thread:$0]  %s53_s0, 64, %s159_s2, [#allocation4]  }
  0x29   :  { %110 = dma.done.wait [#allocation4], 64  }
  0x2a   :  { %111 = vsyncadd [#allocation4], 4294967232 }
  0x2b   :  { %59 = vsyncpa [#allocation3], 1 }
  0x2c   :  { %60 = vsyncpa [#allocation4], 1 }

</bundles_post_ra>
